<compile_context>
chip_gen: v7x
topology: tpu7x:2x2x1
jax: 0.10.0
libtpu: 0.0.40
codegen_flags: <defaults>
</compile_context>

<pallas_src>
import jax
import jax.numpy as jnp
from jax.experimental import pallas as pl
from jax.experimental.pallas import tpu as pltpu

ALPHA = 0.8
GAMMA = 2

_LANES = 128
_SUBLANES = 8
_MAX_BLOCK_ROWS = 2048   # (2048, 128) f32 tile = 1 MiB per pipeline buffer
_PAD_X = 100.0           # with t = 1, logits-form BCE of the pad element is ~0


def _bce_partial_kernel(x_ref, t_ref, o_ref):
    x = x_ref[...].astype(jnp.float32)
    t = t_ref[...].astype(jnp.float32)
    # Logits-form binary cross entropy:
    #   bce = softplus(x) - x*t = max(x, 0) - x*t + log1p(exp(-|x|))
    # Equivalent to -(t*log(p) + (1-t)*log(1-p)) with p = sigmoid(x); matches
    # torch's clamped BCE for |x| < ~100 and uses 2 EUP ops/elem instead of 4.
    bce = jnp.maximum(x, 0.0) - x * t + jnp.log1p(jnp.exp(-jnp.abs(x)))
    # Reduce (block_rows, 128) -> (8, 128) with vreg-wise VPU adds only; the
    # single cross-lane reduction happens once, outside the kernel.
    rows = bce.shape[0]
    o_ref[...] = jnp.sum(
        bce.reshape(rows // _SUBLANES, _SUBLANES, _LANES), axis=0)


def focal_loss(inputs, targets, alpha=ALPHA, gamma=GAMMA, smooth=1):
    """Pallas TPU implementation of FocalLoss.forward (returns a scalar)."""
    del smooth  # unused in the reference forward as well

    x = jnp.reshape(inputs, (-1,))
    t = jnp.reshape(targets, (-1,))
    # Keep the incoming float dtype (e.g. bf16 stays bf16 into the kernel to
    # halve HBM reads); only promote non-float targets/inputs.
    if not jnp.issubdtype(x.dtype, jnp.floating):
        x = x.astype(jnp.float32)
    if not jnp.issubdtype(t.dtype, jnp.floating):
        t = t.astype(jnp.float32)

    n_valid = x.shape[0]

    # Adaptive tiling: big blocks for big inputs, one small block otherwise.
    rows_needed = -(-n_valid // _LANES)
    rows_needed = max(
        _SUBLANES, ((rows_needed + _SUBLANES - 1) // _SUBLANES) * _SUBLANES)
    block_rows = min(_MAX_BLOCK_ROWS, rows_needed)
    num_blocks = -(-rows_needed // block_rows)
    total_rows = num_blocks * block_rows

    n_pad = total_rows * _LANES - n_valid
    if n_pad:
        # Pad with (x=+100, t=1): logits-form BCE of the padding is exactly
        # 0 + a denormal, so no in-kernel mask is needed. Aligned shapes
        # (the common case) skip this copy entirely.
        x = jnp.pad(x, (0, n_pad), constant_values=_PAD_X)
        t = jnp.pad(t, (0, n_pad), constant_values=1.0)

    x2 = x.reshape(total_rows, _LANES)
    t2 = t.reshape(total_rows, _LANES)

    partials = pl.pallas_call(
        _bce_partial_kernel,
        out_shape=jax.ShapeDtypeStruct(
            (num_blocks, _SUBLANES, _LANES), jnp.float32),
        grid=(num_blocks,),
        in_specs=[
            pl.BlockSpec((block_rows, _LANES), lambda i: (i, 0)),
            pl.BlockSpec((block_rows, _LANES), lambda i: (i, 0)),
        ],
        out_specs=pl.BlockSpec((None, _SUBLANES, _LANES), lambda i: (i, 0, 0)),
        compiler_params=pltpu.CompilerParams(
            dimension_semantics=("parallel",)),
    )(x2, t2)

    # Tiny epilogue (O(num_blocks * 1024) sum + a few scalar ops) in plain XLA.
    bce_sum = jnp.sum(partials, dtype=jnp.float32)
    mean_bce = bce_sum / jnp.float32(n_valid)
    one_minus = 1.0 - jnp.exp(-mean_bce)
    if isinstance(gamma, (int, float)) and gamma == 2:
        pow_term = one_minus * one_minus          # avoid float pow for gamma=2
    else:
        pow_term = one_minus ** gamma
    return alpha * pow_term * mean_bce


def _focal_loss_ref(inputs, targets, alpha=ALPHA, gamma=GAMMA):
    """Faithful emulation of the PyTorch module (sigmoid + clamped-log BCE)."""
    p = jax.nn.sigmoid(inputs).reshape(-1).astype(jnp.float32)
    t = targets.reshape(-1).astype(jnp.float32)
    log_p = jnp.maximum(jnp.log(p), -100.0)
    log_1mp = jnp.maximum(jnp.log(1.0 - p), -100.0)
    bce = jnp.mean(-(t * log_p + (1.0 - t) * log_1mp))
    return alpha * (1.0 - jnp.exp(-bce)) ** gamma * bce


if __name__ == "__main__":
    key = jax.random.PRNGKey(0)
    k_in, k_tgt = jax.random.split(key)
    # Typical segmentation-style inputs: NCHW logits, binary targets.
    inputs = jax.random.normal(k_in, (2, 4, 16, 16), dtype=jnp.float32)
    targets = (jax.random.uniform(k_tgt, (2, 4, 16, 16)) > 0.5).astype(
        jnp.float32)

    loss = jax.block_until_ready(focal_loss(inputs, targets))
    ref = jax.block_until_ready(_focal_loss_ref(inputs, targets))

    assert jnp.allclose(loss, ref, rtol=1e-5, atol=1e-6), (loss, ref)
    print("KERNEL_OK")
</pallas_src>

<mosaic_0001>
module attributes {stable_mosaic.version = 11 : i64} {
  func.func @_bce_partial_kernel(%arg0: i32, %arg1: memref<16x128xf32, #tpu.memory_space<vmem>>, %arg2: memref<16x128xf32, #tpu.memory_space<vmem>>, %arg3: memref<1x8x128xf32, #tpu.memory_space<vmem>>) attributes {dimension_semantics = [#tpu.dimension_semantics<parallel>], iteration_bounds = array<i64: 1>, scalar_prefetch = 0 : i64, scratch_operands = 0 : i64, tpu.core_type = #tpu.core_type<tc>, window_params = [{transform_indices = @transform_0, window_bounds = array<i64: 16, 128>}, {transform_indices = @transform_1, window_bounds = array<i64: 16, 128>}, {transform_indices = @transform_2, window_bounds = array<i64: 1, 8, 128>}]} {
    %c0 = arith.constant 0 : index
    %c0_0 = arith.constant 0 : index
    %0 = vector.load %arg1[%c0, %c0_0] : memref<16x128xf32, #tpu.memory_space<vmem>>, vector<16x128xf32>
    %c0_1 = arith.constant 0 : index
    %c0_2 = arith.constant 0 : index
    %1 = vector.load %arg2[%c0_1, %c0_2] : memref<16x128xf32, #tpu.memory_space<vmem>>, vector<16x128xf32>
    %cst = arith.constant 0.000000e+00 : f32
    %2 = vector.broadcast %cst : f32 to vector<16x128xf32>
    %3 = arith.maximumf %0, %2 : vector<16x128xf32>
    %4 = arith.mulf %0, %1 : vector<16x128xf32>
    %5 = arith.subf %3, %4 : vector<16x128xf32>
    %6 = math.absf %0 : vector<16x128xf32>
    %cst_3 = arith.constant 0.000000e+00 : f32
    %7 = vector.broadcast %cst_3 : f32 to vector<16x128xf32>
    %8 = arith.subf %7, %6 : vector<16x128xf32>
    %9 = math.exp %8 : vector<16x128xf32>
    %10 = math.log1p %9 : vector<16x128xf32>
    %11 = arith.addf %5, %10 : vector<16x128xf32>
    %12 = vector.shape_cast %11 : vector<16x128xf32> to vector<2x8x128xf32>
    %cst_4 = arith.constant dense<0.000000e+00> : vector<8x128xf32>
    %13 = vector.multi_reduction <add>, %12, %cst_4 [0] : vector<2x8x128xf32> to vector<8x128xf32>
    %c0_5 = arith.constant 0 : index
    %c0_6 = arith.constant 0 : index
    %c0_7 = arith.constant 0 : index
    %14 = vector.load %arg3[%c0_5, %c0_6, %c0_7] : memref<1x8x128xf32, #tpu.memory_space<vmem>>, vector<1x8x128xf32>
    %15 = vector.shape_cast %14 : vector<1x8x128xf32> to vector<8x128xf32>
    %16 = vector.shape_cast %13 : vector<8x128xf32> to vector<1x8x128xf32>
    tpu.vector_store %arg3[%c0_5, %c0_6, %c0_7], %16 {strides = array<i32>} : memref<1x8x128xf32, #tpu.memory_space<vmem>>, vector<1x8x128xf32>,
    return
  }
  func.func @transform_0(%arg0: i32) -> (i32, i32) {
    %c0_i32 = arith.constant 0 : i32
    %c0_i32_0 = arith.constant 0 : i32
    return %arg0, %c0_i32 : i32, i32
  }
  func.func @transform_1(%arg0: i32) -> (i32, i32) {
    %c0_i32 = arith.constant 0 : i32
    %c0_i32_0 = arith.constant 0 : i32
    return %arg0, %c0_i32 : i32, i32
  }
  func.func @transform_2(%arg0: i32) -> (i32, i32, i32) {
    %c0_i32 = arith.constant 0 : i32
    %c0_i32_0 = arith.constant 0 : i32
    %c0_i32_1 = arith.constant 0 : i32
    return %arg0, %c0_i32, %c0_i32_0 : i32, i32, i32
  }
}

</mosaic_0001>

<bundles_post_ra>
// kernel: tpu_custom_call.1
= control target key start
LH: loop header
LB: loop body
LE: loop exit
PB: predicated region body
PF: predicated region fallthrough
CT: control target
= control target key end

     0   :  { %7 = vsyncpa [#allocation3], 0  ;;  %s237_s0 = inlined_call_operand.hbm [shape: f32[16,128], index: 0, kind: input, shape index: {}]   ;;  %s238_s1 = inlined_call_operand.hbm [shape: f32[16,128], index: 1, kind: input, shape index: {}]   ;;  %s239_s2 = inlined_call_operand.hbm [shape: f32[1,8,128], index: 2, kind: output, shape index: {}]  }
   0x1   :  { %8 = vsyncpa [#allocation6], 0 }
   0x2   :  { %9 = vsyncpa [#allocation4], 0  ;;  %s181_s9 = smov [#allocation2]   ;;  %s109_s13 = scalar_lea.hbm %s237_s0, 256 }
   0x3   :  { %s15_s10 = sshll.u32 %s181_s9, 4  ;;  %p110_p0 = scmp.ne.s32.totalorder %s237_s0, %s109_s13  ;;  %s16_s10 = int_to_ptr.vmem [resolvable:$true] %s15_s10 }
   0x4   :  { %p113_p1 = scmp.lt.u32.totalorder %s109_s13, %s237_s0 }
   0x6   :  { %p115_p2 = pnand %p113_p1, %p110_p0 }
   0x8   :  { %118 = shalt.err (!%p115_p2)
}
   0x9   :  { %s119_s18 = scalar_lea.vmem %s16_s10, 256  ;;  %p124_p4 = scmp.lt.s32.totalorder %s16_s10, %s16_s10 }
   0xa   :  { %p120_p3 = scmp.ne.s32.totalorder %s16_s10, %s119_s18  ;;  %p125_p5 = scmp.lt.s32.totalorder %s119_s18, %s119_s18 }
   0xc   :  { %p126_p6 = por %p125_p5, %p124_p4 }
   0xe   :  { %p127_p7 = pnand %p126_p6, %p120_p3 }
  0x10   :  { %130 = shalt.err (!%p127_p7)
}
  0x11   :  { %s182_s19 = smov 128   ;;  %s183_s20 = smov 8  }
  0x12   :  { %21 = dma.hbm_to_vmem [thread:$0]  %s237_s0, 256, %s16_s10, [#allocation3], %s182_s19, %s182_s19, %s183_s20  }
  0x13   :  { %s184_s23 = smov [#allocation5]   ;;  %s131_s27 = scalar_lea.hbm %s238_s1, 256 }
  0x14   :  { %s27_s24 = sshll.u32 %s184_s23, 4  ;;  %p132_p8 = scmp.ne.s32.totalorder %s238_s1, %s131_s27  ;;  %s28_s24 = int_to_ptr.vmem [resolvable:$true] %s27_s24 }
  0x15   :  { %p135_p9 = scmp.lt.u32.totalorder %s131_s27, %s238_s1 }
  0x17   :  { %p137_p10 = pnand %p135_p9, %p132_p8 }
  0x19   :  { %140 = shalt.err (!%p137_p10)
}
  0x1a   :  { %s141_s4 = scalar_lea.vmem %s28_s24, 256  ;;  %p146_p12 = scmp.lt.s32.totalorder %s28_s24, %s28_s24 }
  0x1b   :  { %p142_p11 = scmp.ne.s32.totalorder %s28_s24, %s141_s4  ;;  %p147_p13 = scmp.lt.s32.totalorder %s141_s4, %s141_s4 }
  0x1d   :  { %p148_p0 = por %p147_p13, %p146_p12 }
  0x1f   :  { %p149_p1 = pnand %p148_p0, %p142_p11 }
  0x21   :  { %152 = shalt.err (!%p149_p1)
}
  0x22   :  { %33 = dma.hbm_to_vmem [thread:$0]  %s238_s1, 256, %s28_s24, [#allocation6], %s182_s19, %s182_s19, %s183_s20  }
  0x23   :  { %175 = dma.done.wait [#allocation3], 256  }
  0x24   :  { %176 = vsyncadd [#allocation3], 4294967040 }
  0x25   :  { %177 = dma.done.wait [#allocation6], 256  }
  0x26   :  { %178 = vsyncadd [#allocation6], 4294967040  ;;  %v40_v0 = vld [vmem:[#allocation2] sm:$0xff]  ;;  %v41_v1 = vld [vmem:[#allocation2 + $0x8] sm:$0xff]  ;;  %s185_s1 = smov [#allocation7]  }
  0x27   :  { %v50_v2 = vand.u32 2147483647, %v40_v0  ;;  %v51_v3 = vand.u32 2147483647, %v41_v1  ;;  %v42_v14 = vld [vmem:[#allocation5] sm:$0xff]  ;;  %v43_v15 = vld [vmem:[#allocation5 + $0x8] sm:$0xff] }
  0x28   :  { %v44_v17 = vmax.f32 %v40_v0, 0.0  ;;  %v46_v18 = vmul.f32 %v42_v14, %v40_v0  ;;  %v45_v21 = vmax.f32 %v41_v1, 0.0  ;;  %v47_v22 = vmul.f32 %v43_v15, %v41_v1  ;;  %s86_s6 = sshll.u32 %s185_s1, 4  ;;  %s87_s6 = int_to_ptr.vmem [resolvable:$true] %s86_s6 }
  0x29   :  { %v52_v4 = vsub.f32 0.0, %v50_v2  ;;  %v53_v5 = vsub.f32 0.0, %v51_v3  ;;  %s153_s7 = scalar_lea.vmem %s87_s6, 128  ;;  %p158_p3 = scmp.lt.s32.totalorder %s87_s6, %s87_s6 }
  0x2a   :  { %v48_v26 = vsub.f32 %v44_v17, %v46_v18  ;;  %v49_v29 = vsub.f32 %v45_v21, %v47_v22  ;;  %p154_p2 = scmp.ne.s32.totalorder %s87_s6, %s153_s7  ;;  %p159_p4 = scmp.lt.s32.totalorder %s153_s7, %s153_s7 }
  0x2b   :  { %v54_v6 = vmul.f32 1.442695, %v52_v4  ;;  %v56_v7 = vmul.f32 1.442695, %v53_v5 }
  0x2c   :  { %p160_p5 = por %p159_p4, %p158_p3 }
  0x2d   :  { %101 = vpow2.f32 %v54_v6 }
  0x2e   :  { %103 = vpow2.f32 %v56_v7  ;;  %p161_p6 = pnand %p160_p5, %p154_p2 }
  0x37   :  { %v102_v8 = vpop.eup %101 }
  0x38   :  { %v104_v9 = vpop.eup %103  ;;  %v58_v10 = vadd.f32 1.0, %v102_v8  ;;  %v61_v12 = vmul.f32 -0.5, %v102_v8  ;;  %v64_v19 = vand.u32 2147483647, %v102_v8 }
  0x39   :  { %v67_v11 = vadd.f32 1.0, %v104_v9  ;;  %v70_v13 = vmul.f32 -0.5, %v104_v9  ;;  %v73_v23 = vand.u32 2147483647, %v104_v9 }
  0x3a   :  { %105 = vlog2.f32 %v58_v10  ;;  %v62_v16 = vadd.f32 1.0, %v61_v12  ;;  %vm65_vm0 = vcmp.lt.f32.partialorder %v64_v19, 0.0004427343 }
  0x3b   :  { %107 = vlog2.f32 %v67_v11  ;;  %v71_v20 = vadd.f32 1.0, %v70_v13  ;;  %vm74_vm1 = vcmp.lt.f32.partialorder %v73_v23, 0.0004427343 }
  0x3c   :  { %v63_v24 = vmul.f32 %v102_v8, %v62_v16 }
  0x3d   :  { %v72_v27 = vmul.f32 %v104_v9, %v71_v20 }
  0x44   :  { %v106_v25 = vpop.eup %105 }
  0x45   :  { %v108_v28 = vpop.eup %107  ;;  %v60_v30 = vmul.f32 0.6931472, %v106_v25 }
  0x46   :  { %v69_v31 = vmul.f32 0.6931472, %v108_v28 }
  0x47   :  { %v66_v32 = vsel %vm65_vm0, %v63_v24, %v60_v30 }
  0x48   :  { %v75_v33 = vsel %vm74_vm1, %v72_v27, %v69_v31  ;;  %v76_v34 = vadd.f32 %v66_v32, %v48_v26 }
  0x49   :  { %v77_v35 = vadd.f32 %v75_v33, %v49_v29 }
  0x4b   :  { %v78_v36 = vadd.f32 %v77_v35, %v76_v34 }
  0x4d   :  { %79 = vst [vmem:[#allocation7] sm:$0xff] %v78_v36 }
  0x4e   :  { %164 = shalt.err (!%p161_p6)
}
  0x4f   :  { %s165_s10 = scalar_lea.hbm %s239_s2, 128 }
  0x50   :  { %p166_p7 = scmp.ne.s32.totalorder %s239_s2, %s165_s10  ;;  %p169_p8 = scmp.lt.u32.totalorder %s165_s10, %s239_s2 }
  0x52   :  { %p171_p9 = pnand %p169_p8, %p166_p7 }
  0x54   :  { %174 = shalt.err (!%p171_p9)
}
  0x55   :  { %89 = dma.vmem_to_hbm [thread:$0]  %s87_s6, 128, %s239_s2, [#allocation4]  }
  0x56   :  { %179 = dma.done.wait [#allocation4], 128  }
  0x57   :  { %180 = vsyncadd [#allocation4], 4294967168 }
  0x58   :  { %93 = vsyncpa [#allocation3], 1 }
  0x59   :  { %94 = vsyncpa [#allocation6], 1 }
  0x5a   :  { %95 = vsyncpa [#allocation4], 1 }

</bundles_post_ra>
